<compile_context>
chip_gen: v5e
topology: v5e:2x2
jax: 0.10.0
libtpu: 0.0.40
codegen_flags: <defaults>
</compile_context>

<pallas_src>
import jax
import jax.numpy as jnp
from jax.experimental import pallas as pl
from jax.experimental.pallas import tpu as pltpu

VOCAB_SIZE = 100
EMBED_DIM = 32
NEG_INF = -1e30
LANE = 128
SUBLANE = 8
VOCAB_PAD = ((VOCAB_SIZE + LANE - 1) // LANE) * LANE   # 128


def skipgram_kernel(ids_ref, emb_ref, wt_ref, out_ref):
    """Fused embedding lookup + output projection + masked log_softmax.

    ids_ref : (Bp, 1)  int32  token ids (padded batch rows hold id 0)
    emb_ref : (Vp, D)  bf16   embedding table (rows >= VOCAB_SIZE are zero)
    wt_ref  : (D, Vp)  bf16   output weight transposed (cols >= VOCAB_SIZE pad)
    out_ref : (Bp, Vp) f32    log-probs (padded rows/cols sliced off outside)
    """
    ids = ids_ref[...]                                            # (Bp, 1) int32
    b, vp = out_ref.shape

    # Single column iota, reused for the one-hot and the padding mask.
    col = jax.lax.broadcasted_iota(jnp.int32, (b, vp), 1)

    # Embedding gather as a one-hot matmul on the MXU (bf16 in, f32 acc).
    onehot = (col == ids).astype(jnp.bfloat16)                    # (Bp, Vp) exact
    embeds = jnp.dot(onehot, emb_ref[...],
                     preferred_element_type=jnp.float32)          # (Bp, D) f32

    # Output projection (bias=False). embeds holds exact bf16 values -> the
    # cast back to bf16 is lossless; accumulation stays f32.
    logits = jnp.dot(embeds.astype(jnp.bfloat16), wt_ref[...],
                     preferred_element_type=jnp.float32)          # (Bp, Vp)

    # Mask the vocab padding, then row-wise numerically-stable log_softmax
    # entirely in f32 (v5e has no bf16 VPU/EUP path).
    logits = jnp.where(col < VOCAB_SIZE, logits, NEG_INF)
    m = jnp.max(logits, axis=-1, keepdims=True)
    lse = m + jnp.log(jnp.sum(jnp.exp(logits - m), axis=-1, keepdims=True))
    out_ref[...] = logits - lse


@jax.jit
def skipgram_forward(params, inputs):
    """inputs: (B,) int32 token ids -> (B, VOCAB_SIZE) f32 log-probs."""
    ids = inputs.astype(jnp.int32).reshape(-1, 1)                 # (B, 1)
    B = ids.shape[0]

    # Pad batch to a multiple of 8 so output stores are sublane-unmasked.
    B_pad = ((B + SUBLANE - 1) // SUBLANE) * SUBLANE
    if B_pad != B:
        ids = jnp.pad(ids, ((0, B_pad - B), (0, 0)))              # pad id = 0

    emb_pad = params["emb_pad"]                                   # (Vp, D) bf16
    wt_pad = params["wt_pad"]                                     # (D, Vp) bf16

    out = pl.pallas_call(
        skipgram_kernel,
        out_shape=jax.ShapeDtypeStruct((B_pad, VOCAB_PAD), jnp.float32),
        in_specs=[
            pl.BlockSpec(memory_space=pltpu.MemorySpace.VMEM),    # token ids
            pl.BlockSpec(memory_space=pltpu.MemorySpace.VMEM),    # embedding
            pl.BlockSpec(memory_space=pltpu.MemorySpace.VMEM),    # output W^T
        ],
        out_specs=pl.BlockSpec(memory_space=pltpu.MemorySpace.VMEM),
    )(ids, emb_pad, wt_pad)
    return out[:B, :VOCAB_SIZE]


def init_params(key):
    k_emb, k_out = jax.random.split(key)
    # nn.Embedding default init ~ N(0, 1).
    embedding = jax.random.normal(k_emb, (VOCAB_SIZE, EMBED_DIM), jnp.float32)
    # nn.Linear(embedding_dim, vocab_size, bias=False) computes x @ W.T;
    # store W^T directly as (D, V).
    w_out_t = 0.1 * jax.random.normal(k_out, (EMBED_DIM, VOCAB_SIZE), jnp.float32)

    # Pre-padded, bf16 copies used by the kernel (done ONCE, not per call).
    emb_pad = jnp.pad(embedding, ((0, VOCAB_PAD - VOCAB_SIZE), (0, 0))
                      ).astype(jnp.bfloat16)                      # (Vp, D)
    wt_pad = jnp.pad(w_out_t, ((0, 0), (0, VOCAB_PAD - VOCAB_SIZE))
                     ).astype(jnp.bfloat16)                       # (D, Vp)

    return {
        "embedding": embedding,   # f32 originals kept for reference checks
        "w_out_t": w_out_t,
        "emb_pad": emb_pad,       # kernel inputs
        "wt_pad": wt_pad,
    }


if __name__ == "__main__":
    key = jax.random.PRNGKey(0)
    k_param, k_tok = jax.random.split(key)
    params = init_params(k_param)

    B = 8
    inputs = jax.random.randint(k_tok, (B,), 0, VOCAB_SIZE, dtype=jnp.int32)

    log_probs = jax.block_until_ready(skipgram_forward(params, inputs))

    assert log_probs.shape == (B, VOCAB_SIZE)
    assert bool(jnp.all(jnp.isfinite(log_probs)))
    # Each row should be a valid log-probability distribution.
    probs_sum = jnp.sum(jnp.exp(log_probs), axis=1)
    assert bool(jnp.all(jnp.abs(probs_sum - 1.0) < 1e-3))

    # Cross-check against a plain-JAX f32 reference of the same forward pass.
    # Kernel matmul inputs are bf16 (MXU-native), so allow bf16 rounding error.
    ref = jax.nn.log_softmax(
        jnp.take(params["embedding"], inputs, axis=0) @ params["w_out_t"], axis=1)
    assert bool(jnp.max(jnp.abs(log_probs - ref)) < 2e-2)

    print("KERNEL_OK")
</pallas_src>

<mosaic_0001>
module attributes {stable_mosaic.version = 11 : i64} {
  func.func @skipgram_kernel(%arg0: memref<8x1xi32, #tpu.memory_space<vmem>>, %arg1: memref<128x32xbf16, #tpu.memory_space<vmem>>, %arg2: memref<32x128xbf16, #tpu.memory_space<vmem>>, %arg3: memref<8x128xf32, #tpu.memory_space<vmem>>) attributes {dimension_semantics = [], scalar_prefetch = 0 : i64, scratch_operands = 0 : i64, tpu.core_type = #tpu.core_type<tc>} {
    %c0 = arith.constant 0 : index
    %c0_0 = arith.constant 0 : index
    %0 = vector.load %arg0[%c0, %c0_0] : memref<8x1xi32, #tpu.memory_space<vmem>>, vector<8x1xi32>
    %1 = tpu.iota {dimensions = array<i32: 1>} : vector<8x128xi32>
    %2 = vector.broadcast %0 : vector<8x1xi32> to vector<8x128xi32>
    %3 = arith.cmpi eq, %1, %2 : vector<8x128xi32>
    %4 = arith.extui %3 : vector<8x128xi1> to vector<8x128xi32>
    %5 = arith.sitofp %4 : vector<8x128xi32> to vector<8x128xf32>
    %6 = arith.truncf %5 : vector<8x128xf32> to vector<8x128xbf16>
    %c0_1 = arith.constant 0 : index
    %c0_2 = arith.constant 0 : index
    %7 = vector.load %arg1[%c0_1, %c0_2] : memref<128x32xbf16, #tpu.memory_space<vmem>>, vector<128x32xbf16>
    %cst = arith.constant dense<0.000000e+00> : vector<8x32xf32>
    %8 = tpu.matmul %6, %7, %cst {dimension_numbers = #tpu.dot_dimension_numbers<[1], [0], [0], [1], [0, 0, 1, 1], [], []>} : vector<8x128xbf16>, vector<128x32xbf16>, vector<8x32xf32> -> vector<8x32xf32>
    %9 = arith.truncf %8 : vector<8x32xf32> to vector<8x32xbf16>
    %c0_3 = arith.constant 0 : index
    %c0_4 = arith.constant 0 : index
    %10 = vector.load %arg2[%c0_3, %c0_4] : memref<32x128xbf16, #tpu.memory_space<vmem>>, vector<32x128xbf16>
    %cst_5 = arith.constant dense<0.000000e+00> : vector<8x128xf32>
    %11 = tpu.matmul %9, %10, %cst_5 {dimension_numbers = #tpu.dot_dimension_numbers<[1], [0], [0], [1], [0, 0, 1, 1], [], []>} : vector<8x32xbf16>, vector<32x128xbf16>, vector<8x128xf32> -> vector<8x128xf32>
    %c100_i32 = arith.constant 100 : i32
    %12 = vector.broadcast %c100_i32 : i32 to vector<8x128xi32>
    %13 = arith.cmpi slt, %1, %12 : vector<8x128xi32>
    %cst_6 = arith.constant -1.000000e+30 : f32
    %14 = vector.broadcast %cst_6 : f32 to vector<8x128xf32>
    %15 = arith.select %13, %11, %14 : vector<8x128xi1>, vector<8x128xf32>
    %cst_7 = arith.constant dense<0xFF800000> : vector<8xf32>
    %16 = vector.multi_reduction <maximumf>, %15, %cst_7 [1] : vector<8x128xf32> to vector<8xf32>
    %17 = vector.shape_cast %16 : vector<8xf32> to vector<8x1xf32>
    %18 = vector.broadcast %17 : vector<8x1xf32> to vector<8x128xf32>
    %19 = arith.subf %15, %18 : vector<8x128xf32>
    %20 = math.exp %19 : vector<8x128xf32>
    %cst_8 = arith.constant dense<0.000000e+00> : vector<8xf32>
    %21 = vector.multi_reduction <add>, %20, %cst_8 [1] : vector<8x128xf32> to vector<8xf32>
    %22 = vector.shape_cast %21 : vector<8xf32> to vector<8x1xf32>
    %23 = math.log %22 : vector<8x1xf32>
    %24 = arith.addf %17, %23 : vector<8x1xf32>
    %25 = vector.broadcast %24 : vector<8x1xf32> to vector<8x128xf32>
    %26 = arith.subf %15, %25 : vector<8x128xf32>
    %c0_9 = arith.constant 0 : index
    %c0_10 = arith.constant 0 : index
    %27 = vector.load %arg3[%c0_9, %c0_10] : memref<8x128xf32, #tpu.memory_space<vmem>>, vector<8x128xf32>
    tpu.vector_store %arg3[%c0_9, %c0_10], %26 {strides = array<i32>} : memref<8x128xf32, #tpu.memory_space<vmem>>, vector<8x128xf32>,
    return
  }
}

</mosaic_0001>

<bundles_post_ra>
// kernel: skipgram_forward.1
= control target key start
LH: loop header
LB: loop body
LE: loop exit
PB: predicated region body
PF: predicated region fallthrough
CT: control target
= control target key end

     0   :  { %v255_v2 = vmov 0   ;;  %s314_s0 = inlined_call_operand.vmem [shape: s32[8,1], index: 0, kind: input, shape index: {}]   ;;  %s315_s1 = inlined_call_operand.vmem [shape: bf16[128,32], index: 1, kind: input, shape index: {}]   ;;  %s316_s2 = inlined_call_operand.vmem [shape: bf16[32,128], index: 2, kind: input, shape index: {}]   ;;  %s317_s3 = inlined_call_operand.hbm [shape: f32[8,128], index: 3, kind: output, shape index: {}]  }
   0x1   :  { %v16_v0 = vld [vmem:[%s314_s0] sm:$0xff]  ;;  %v218_v1 = vld [vmem:[%s315_s1 + $0x38] sm:$0xff]  ;;  %224 = vset.pattern.permute.xlu0 %v255_v2  ;;  %v217_v3 = vld [vmem:[%s315_s1 + $0x30] sm:$0xff] }
   0x2   :  { %20 = vperm.xlu0 %224, %v16_v0   ;;  %90 = vmatpush.bf16.msra.mxu0 %v218_v1 }
   0x3   :  { %8 = vsyncpa [#allocation3], 0  ;;  %v216_v4 = vld [vmem:[%s315_s1 + $0x28] sm:$0xff]  ;;  %v215_v5 = vld [vmem:[%s315_s1 + $0x20] sm:$0xff]  ;;  %v17_v11 = vlaneseq  ;;  %v256_v14 = vmov 1.0|1.0  }
   0x4   :  { %v214_v6 = vld [vmem:[%s315_s1 + $0x18] sm:$0xff]  ;;  %v213_v7 = vld [vmem:[%s315_s1 + $0x10] sm:$0xff]  ;;  %v212_v8 = vld [vmem:[%s315_s1 + $0x8] sm:$0xff]  ;;  %vm120_vm2 = vcmask 261120   ;;  %s158_s8 = sshll.u32 %s317_s3, 4  ;;  %s159_s8 = int_to_ptr.hbm [resolvable:$true] %s158_s8 }
   0x5   :  { %v211_v9 = vld [vmem:[%s315_s1] sm:$0xff]  ;;  %v220_v10 = vld [vmem:[%s316_s2 + $0x8] sm:$0xff]  ;;  %v18_v12 = vand.u32 127, %v17_v11  ;;  %s257_s1 = smov [#allocation2]  }
   0x6   :  { %91 = vmatpush.bf16.msra.mxu0 %v217_v3  ;;  %130 = vmatpush.bf16.msra.mxu1 %v220_v10  ;;  %v219_v15 = vld [vmem:[%s316_s2] sm:$0xff]  ;;  %s156_s2 = sshll.u32 %s257_s1, 4  ;;  %s157_s2 = int_to_ptr.vmem [resolvable:$true] %s156_s2 }
   0x7   :  { %vm137_vm3 = vcmp.lt.s32.totalorder %v18_v12, 100 }
   0xa   :  { %92 = vmatpush.bf16.msra.mxu0 %v216_v4  ;;  %131 = vmatpush.bf16.msra.mxu1 %v219_v15 }
   0xe   :  { %93 = vmatpush.bf16.msra.mxu0 %v215_v5 }
  0x12   :  { %94 = vmatpush.bf16.msra.mxu0 %v214_v6 }
  0x16   :  { %95 = vmatpush.bf16.msra.mxu0 %v213_v7 }
  0x1a   :  { %96 = vmatpush.bf16.msra.mxu0 %v212_v8 }
  0x1e   :  { %97 = vmatpush.bf16.msra.mxu0 %v211_v9 }
  0x74   :  { %v21_v13 = vpop.permute.xlu0 %20 }
  0x75   :  { %vm22_vm0 = vcmp.eq.s32.totalorder %v18_v12, %v21_v13 }
  0x76   :  { %vm200_vm1 = vmpackc.low %vm22_vm0, %vm22_vm0 }
  0x77   :  { %201 = vmatmul.msk.bf16.vlgmr.msra.gmra.mxu0 %vm200_vm1, %v256_v14 }
  0xf4   :  { %v99_v16 = vpop.f32.mrf.mxu0 }
  0xf5   :  { %v103_v17 = vpack.c.bf16 %v99_v16, %v99_v16 }
  0xf7   :  { %210 = vmatmul.msk.bf16.vlgmr.msra.gmra.mxu1 %vm120_vm2, %v103_v17 }
  0xfc   :  { %v101_v18 = vpop.f32.mrf.mxu0 }
 0x174   :  { %v133_v19 = vpop.f32.mrf.mxu1 }
 0x175   :  { %v138_v20 = vsel %vm137_vm3, %v133_v19, -1e+30 }
 0x176   :  { %139 = vmax.xlane.f32.xlu0 %v138_v20 }
 0x17c   :  { %v135_v21 = vpop.f32.mrf.mxu1 }
 0x1e9   :  { %v140_v22 = vpop.xlane.xlu0 %139 }
 0x1ea   :  { %v141_v23 = vsub.f32 %v138_v20, %v140_v22 }
 0x1ec   :  { %v142_v24 = vmul.f32 1.442695, %v141_v23 }
 0x1ee   :  { %225 = vpow2.f32 %v142_v24 }
 0x1f4   :  { %v226_v25 = vpop.eup %225 }
 0x1f5   :  { %144 = vadd.xlane.f32.xlu1 %v226_v25 }
 0x268   :  { %v145_v26 = vpop.xlane.xlu1 %144 }
 0x269   :  { %227 = vlog2.f32 %v145_v26 }
 0x26f   :  { %v228_v27 = vpop.eup %227 }
 0x270   :  { %v147_v28 = vmul.f32 0.6931472, %v228_v27 }
 0x272   :  { %v148_v29 = vadd.f32 %v147_v28, %v140_v22 }
 0x274   :  { %v149_v30 = vsub.f32 %v138_v20, %v148_v29 }
 0x276   :  { %150 = vst [vmem:[#allocation2] sm:$0xff] %v149_v30 }
 0x277   :  { %161 = dma.vmem_to_hbm [thread:$0]  %s157_s2, 128, %s159_s8, [#allocation3]  }
 0x278   :  { %253 = dma.done.wait [#allocation3], 128  }
 0x279   :  { %254 = vsyncadd [#allocation3], 4294967168 }
 0x27a   :  { %166 = vsyncpa [#allocation3], 1 }

</bundles_post_ra>
